<compile_context>
chip_gen: v5e
topology: v5e:2x2
jax: 0.10.0
libtpu: 0.0.40
codegen_flags: <defaults>
</compile_context>

<pallas_src>
import functools

import jax
import jax.numpy as jnp
import numpy as np
from jax import lax
from jax.experimental import pallas as pl
from jax.experimental.pallas import tpu as pltpu


def _decoder_kernel(z_ref, wih_t_ref, whh_t_ref, b_ref, wfc_t_ref, bfc_ref,
                    out_ref, hs_ref):
    """LSTM unroll (t=0 peeled) + deferred, lane-dense output projection.

    z_ref:     (Bp, L)     latent input (same at every timestep), batch padded
    wih_t_ref: (L, 4H)     W_ih^T   (PyTorch gate order: i, f, g, o)
    whh_t_ref: (H, 4H)     W_hh^T
    b_ref:     (1, 4H)     b_ih + b_hh
    wfc_t_ref: (H, Op)     fc_out.weight^T zero-padded to Op (=128) lanes
    bfc_ref:   (1, Op)     fc_out.bias zero-padded to Op lanes
    out_ref:   (T*Bp, Op)  flat, lane-dense projected hidden states
    hs_ref:    (T*Bp, H)   VMEM scratch holding the hidden states
    """
    B = z_ref.shape[0]
    H = whh_t_ref.shape[0]
    G = 4 * H
    T = hs_ref.shape[0] // B

    # ---- hoisted, loop-invariant work ----
    whh = whh_t_ref[...]                                                # (H,4H)
    x_gates = jnp.dot(z_ref[...], wih_t_ref[...],
                      precision=lax.Precision.DEFAULT,
                      preferred_element_type=jnp.float32) + b_ref[...]  # (B,4H)
    lane = lax.broadcasted_iota(jnp.int32, (B, G), 1)
    g_lanes = (lane >= 2 * H) & (lane < 3 * H)     # tanh-gate (g) lanes
    scale = jnp.where(g_lanes, jnp.float32(1.0), jnp.float32(0.5))

    def gate_act(gates):
        # One EUP launch for all four gates: sigmoid(x) = 0.5*(1 + tanh(x/2)).
        y = jnp.tanh(gates * scale)
        return jnp.where(g_lanes, y, 0.5 * y + 0.5)

    # ---- t = 0 peeled: h0 = c0 = 0  =>  gates_0 == x_gates ----
    act = gate_act(x_gates)
    i = act[:, 0 * H:1 * H]
    g = act[:, 2 * H:3 * H]
    o = act[:, 3 * H:4 * H]
    c = i * g
    h = o * jnp.tanh(c)
    hs_ref[0:B, :] = h

    # ---- remaining T-1 steps, fully unrolled (static, aligned offsets) ----
    for t in range(1, T):
        gates = x_gates + jnp.dot(h, whh,
                                  precision=lax.Precision.DEFAULT,
                                  preferred_element_type=jnp.float32)
        act = gate_act(gates)
        i = act[:, 0 * H:1 * H]
        f = act[:, 1 * H:2 * H]
        g = act[:, 2 * H:3 * H]
        o = act[:, 3 * H:4 * H]
        c = f * c + i * g
        h = o * jnp.tanh(c)
        hs_ref[t * B:(t + 1) * B, :] = h       # store is off the dep. chain

    # ---- deferred projection: one matmul, one bias add, one slab store ----
    y = jnp.dot(hs_ref[...], wfc_t_ref[...],
                precision=lax.Precision.DEFAULT,
                preferred_element_type=jnp.float32) + bfc_ref[...]   # (T*B,Op)
    out_ref[...] = y


def prepare_decoder_params(params, out_lane_pad=128):
    """One-time parameter preprocessing; keep it OFF the per-call path."""
    H = params["w_hh"].shape[1]
    O = params["w_fc"].shape[0]
    Op = max(out_lane_pad, -(-O // out_lane_pad) * out_lane_pad)
    wfc_t = jnp.transpose(params["w_fc"]).astype(jnp.float32)            # (H,O)
    bfc = params["b_fc"].astype(jnp.float32).reshape(1, O)
    return {
        "wih_t": jnp.transpose(params["w_ih"]).astype(jnp.float32),      # (L,4H)
        "whh_t": jnp.transpose(params["w_hh"]).astype(jnp.float32),      # (H,4H)
        "b": (params["b_ih"] + params["b_hh"]).astype(jnp.float32)
             .reshape(1, 4 * H),                                         # (1,4H)
        "wfc_t": jnp.pad(wfc_t, ((0, 0), (0, Op - O))),                  # (H,Op)
        "bfc": jnp.pad(bfc, ((0, 0), (0, Op - O))),                      # (1,Op)
    }


@functools.partial(jax.jit, static_argnums=(2, 3))
def decoder_forward(z, prepped, seq_length, output_dim):
    """z: (B, latent_dim) -> (B, seq_length, output_dim)."""
    B, _ = z.shape
    H = prepped["whh_t"].shape[0]
    Op = prepped["wfc_t"].shape[1]

    # Pad batch to the 8-sublane width so in-kernel ops/stores are unmasked.
    B_pad = max(8, -(-B // 8) * 8)
    z_pad = jnp.pad(z.astype(jnp.float32), ((0, B_pad - B), (0, 0)))

    vmem = pl.BlockSpec(memory_space=pltpu.MemorySpace.VMEM)
    out_flat = pl.pallas_call(
        _decoder_kernel,
        out_shape=jax.ShapeDtypeStruct((seq_length * B_pad, Op), jnp.float32),
        in_specs=[vmem] * 6,
        out_specs=vmem,
        scratch_shapes=[pltpu.VMEM((seq_length * B_pad, H), jnp.float32)],
    )(z_pad, prepped["wih_t"], prepped["whh_t"], prepped["b"],
      prepped["wfc_t"], prepped["bfc"])

    # (T*Bp, Op) -> (B, T, O); slice off lane + batch padding. Tiny XLA-side
    # slice/reshape/transpose; all real work happened in one kernel call.
    out = out_flat[:, :output_dim].reshape(seq_length, B_pad, output_dim)
    return jnp.transpose(out[:, :B, :], (1, 0, 2))


def _reference_forward(z, params, seq_length):
    """Pure-JAX reference (same math as torch.nn.LSTM + Linear)."""
    w_ih, w_hh = params["w_ih"], params["w_hh"]
    b = params["b_ih"] + params["b_hh"]
    w_fc, b_fc = params["w_fc"], params["b_fc"]
    H = w_hh.shape[1]
    B = z.shape[0]

    x_gates = z @ w_ih.T + b  # (B, 4H), constant over time

    def step(carry, _):
        h, c = carry
        gates = x_gates + h @ w_hh.T
        i = jax.nn.sigmoid(gates[:, 0 * H:1 * H])
        f = jax.nn.sigmoid(gates[:, 1 * H:2 * H])
        g = jnp.tanh(gates[:, 2 * H:3 * H])
        o = jax.nn.sigmoid(gates[:, 3 * H:4 * H])
        c = f * c + i * g
        h = o * jnp.tanh(c)
        return (h, c), h

    (_, _), hs = lax.scan(step, (jnp.zeros((B, H)), jnp.zeros((B, H))),
                          None, length=seq_length)
    hs = jnp.transpose(hs, (1, 0, 2))               # (B, T, H)
    return hs @ w_fc.T + b_fc                       # (B, T, O)


def init_params(key, latent_dim, hidden_dim, output_dim):
    """Deterministic init mirroring PyTorch's uniform(-1/sqrt(fan), +1/sqrt(fan))."""
    k_lstm = 1.0 / np.sqrt(hidden_dim)
    k_fc = 1.0 / np.sqrt(hidden_dim)
    keys = jax.random.split(key, 6)
    u = lambda k, shape, s: jax.random.uniform(k, shape, jnp.float32, -s, s)
    return {
        "w_ih": u(keys[0], (4 * hidden_dim, latent_dim), k_lstm),
        "w_hh": u(keys[1], (4 * hidden_dim, hidden_dim), k_lstm),
        "b_ih": u(keys[2], (4 * hidden_dim,), k_lstm),
        "b_hh": u(keys[3], (4 * hidden_dim,), k_lstm),
        "w_fc": u(keys[4], (output_dim, hidden_dim), k_fc),
        "b_fc": u(keys[5], (output_dim,), k_fc),
    }


if __name__ == "__main__":
    latent_dim, hidden_dim, output_dim = 16, 32, 2
    batch, seq_length = 2, 8

    key = jax.random.PRNGKey(0)
    k_param, k_z = jax.random.split(key)
    params = init_params(k_param, latent_dim, hidden_dim, output_dim)
    z = jax.random.normal(k_z, (batch, latent_dim), jnp.float32)

    prepped = prepare_decoder_params(params)           # one-time, off hot path
    out = decoder_forward(z, prepped, seq_length, output_dim)
    out = jax.block_until_ready(out)

    assert out.shape == (batch, seq_length, output_dim), out.shape

    ref = jax.block_until_ready(_reference_forward(z, params, seq_length))
    # Kernel uses the mathematically exact sigmoid(x)=0.5*(1+tanh(x/2))
    # formulation; combined with bf16 MXU passes this can differ from the
    # jax.nn.sigmoid reference by a few e-5 after 8 recurrence steps, so the
    # tolerance is set accordingly (still catches any real gate/weight bug).
    np.testing.assert_allclose(np.asarray(out), np.asarray(ref),
                               rtol=1e-4, atol=5e-5)

    print("KERNEL_OK")
</pallas_src>

<mosaic_0001>
module attributes {stable_mosaic.version = 11 : i64} {
  func.func @_decoder_kernel(%arg0: memref<8x16xf32, #tpu.memory_space<vmem>>, %arg1: memref<16x128xf32, #tpu.memory_space<vmem>>, %arg2: memref<32x128xf32, #tpu.memory_space<vmem>>, %arg3: memref<1x128xf32, #tpu.memory_space<vmem>>, %arg4: memref<32x128xf32, #tpu.memory_space<vmem>>, %arg5: memref<1x128xf32, #tpu.memory_space<vmem>>, %arg6: memref<64x128xf32, #tpu.memory_space<vmem>>, %arg7: memref<64x32xf32, #tpu.memory_space<vmem>>) attributes {dimension_semantics = [], scalar_prefetch = 0 : i64, scratch_operands = 1 : i64, tpu.core_type = #tpu.core_type<tc>} {
    %c0 = arith.constant 0 : index
    %c0_0 = arith.constant 0 : index
    %0 = vector.load %arg2[%c0, %c0_0] : memref<32x128xf32, #tpu.memory_space<vmem>>, vector<32x128xf32>
    %c0_1 = arith.constant 0 : index
    %c0_2 = arith.constant 0 : index
    %1 = vector.load %arg0[%c0_1, %c0_2] : memref<8x16xf32, #tpu.memory_space<vmem>>, vector<8x16xf32>
    %c0_3 = arith.constant 0 : index
    %c0_4 = arith.constant 0 : index
    %2 = vector.load %arg1[%c0_3, %c0_4] : memref<16x128xf32, #tpu.memory_space<vmem>>, vector<16x128xf32>
    %cst = arith.constant dense<0.000000e+00> : vector<8x128xf32>
    %3 = tpu.matmul %1, %2, %cst {dimension_numbers = #tpu.dot_dimension_numbers<[1], [0], [0], [1], [0, 0, 1, 1], [], []>} : vector<8x16xf32>, vector<16x128xf32>, vector<8x128xf32> -> vector<8x128xf32>
    %c0_5 = arith.constant 0 : index
    %c0_6 = arith.constant 0 : index
    %4 = vector.load %arg3[%c0_5, %c0_6] : memref<1x128xf32, #tpu.memory_space<vmem>>, vector<1x128xf32>
    %5 = vector.broadcast %4 : vector<1x128xf32> to vector<8x128xf32>
    %6 = arith.addf %3, %5 : vector<8x128xf32>
    %7 = tpu.iota {dimensions = array<i32: 1>} : vector<8x128xi32>
    %c64_i32 = arith.constant 64 : i32
    %8 = vector.broadcast %c64_i32 : i32 to vector<8x128xi32>
    %9 = arith.cmpi sge, %7, %8 : vector<8x128xi32>
    %c96_i32 = arith.constant 96 : i32
    %10 = vector.broadcast %c96_i32 : i32 to vector<8x128xi32>
    %11 = arith.cmpi slt, %7, %10 : vector<8x128xi32>
    %12 = arith.andi %9, %11 : vector<8x128xi1>
    %cst_7 = arith.constant 1.000000e+00 : f32
    %cst_8 = arith.constant 5.000000e-01 : f32
    %13 = vector.broadcast %cst_7 : f32 to vector<8x128xf32>
    %14 = vector.broadcast %cst_8 : f32 to vector<8x128xf32>
    %15 = arith.select %12, %13, %14 : vector<8x128xi1>, vector<8x128xf32>
    %16 = arith.mulf %6, %15 : vector<8x128xf32>
    %17 = math.tanh %16 : vector<8x128xf32>
    %cst_9 = arith.constant 5.000000e-01 : f32
    %18 = vector.broadcast %cst_9 : f32 to vector<8x128xf32>
    %19 = arith.mulf %18, %17 : vector<8x128xf32>
    %cst_10 = arith.constant 5.000000e-01 : f32
    %20 = vector.broadcast %cst_10 : f32 to vector<8x128xf32>
    %21 = arith.addf %19, %20 : vector<8x128xf32>
    %22 = arith.select %12, %17, %21 : vector<8x128xi1>, vector<8x128xf32>
    %23 = vector.extract_strided_slice %22 {offsets = [0, 0], sizes = [8, 32], strides = [1, 1]} : vector<8x128xf32> to vector<8x32xf32>
    %24 = vector.extract_strided_slice %22 {offsets = [0, 64], sizes = [8, 32], strides = [1, 1]} : vector<8x128xf32> to vector<8x32xf32>
    %25 = vector.extract_strided_slice %22 {offsets = [0, 96], sizes = [8, 32], strides = [1, 1]} : vector<8x128xf32> to vector<8x32xf32>
    %26 = arith.mulf %23, %24 : vector<8x32xf32>
    %27 = math.tanh %26 : vector<8x32xf32>
    %28 = arith.mulf %25, %27 : vector<8x32xf32>
    %c0_11 = arith.constant 0 : index
    %c0_12 = arith.constant 0 : index
    %29 = vector.load %arg7[%c0_11, %c0_12] : memref<64x32xf32, #tpu.memory_space<vmem>>, vector<8x32xf32>
    tpu.vector_store %arg7[%c0_11, %c0_12], %28 {strides = array<i32>} : memref<64x32xf32, #tpu.memory_space<vmem>>, vector<8x32xf32>,
    %cst_13 = arith.constant dense<0.000000e+00> : vector<8x128xf32>
    %30 = tpu.matmul %28, %0, %cst_13 {dimension_numbers = #tpu.dot_dimension_numbers<[1], [0], [0], [1], [0, 0, 1, 1], [], []>} : vector<8x32xf32>, vector<32x128xf32>, vector<8x128xf32> -> vector<8x128xf32>
    %31 = arith.addf %6, %30 : vector<8x128xf32>
    %32 = arith.mulf %31, %15 : vector<8x128xf32>
    %33 = math.tanh %32 : vector<8x128xf32>
    %cst_14 = arith.constant 5.000000e-01 : f32
    %34 = vector.broadcast %cst_14 : f32 to vector<8x128xf32>
    %35 = arith.mulf %34, %33 : vector<8x128xf32>
    %cst_15 = arith.constant 5.000000e-01 : f32
    %36 = vector.broadcast %cst_15 : f32 to vector<8x128xf32>
    %37 = arith.addf %35, %36 : vector<8x128xf32>
    %38 = arith.select %12, %33, %37 : vector<8x128xi1>, vector<8x128xf32>
    %39 = vector.extract_strided_slice %38 {offsets = [0, 0], sizes = [8, 32], strides = [1, 1]} : vector<8x128xf32> to vector<8x32xf32>
    %40 = vector.extract_strided_slice %38 {offsets = [0, 32], sizes = [8, 32], strides = [1, 1]} : vector<8x128xf32> to vector<8x32xf32>
    %41 = vector.extract_strided_slice %38 {offsets = [0, 64], sizes = [8, 32], strides = [1, 1]} : vector<8x128xf32> to vector<8x32xf32>
    %42 = vector.extract_strided_slice %38 {offsets = [0, 96], sizes = [8, 32], strides = [1, 1]} : vector<8x128xf32> to vector<8x32xf32>
    %43 = arith.mulf %40, %26 : vector<8x32xf32>
    %44 = arith.mulf %39, %41 : vector<8x32xf32>
    %45 = arith.addf %43, %44 : vector<8x32xf32>
    %46 = math.tanh %45 : vector<8x32xf32>
    %47 = arith.mulf %42, %46 : vector<8x32xf32>
    %c8 = arith.constant 8 : index
    %c0_16 = arith.constant 0 : index
    %48 = vector.load %arg7[%c8, %c0_16] : memref<64x32xf32, #tpu.memory_space<vmem>>, vector<8x32xf32>
    tpu.vector_store %arg7[%c8, %c0_16], %47 {strides = array<i32>} : memref<64x32xf32, #tpu.memory_space<vmem>>, vector<8x32xf32>,
    %cst_17 = arith.constant dense<0.000000e+00> : vector<8x128xf32>
    %49 = tpu.matmul %47, %0, %cst_17 {dimension_numbers = #tpu.dot_dimension_numbers<[1], [0], [0], [1], [0, 0, 1, 1], [], []>} : vector<8x32xf32>, vector<32x128xf32>, vector<8x128xf32> -> vector<8x128xf32>
    %50 = arith.addf %6, %49 : vector<8x128xf32>
    %51 = arith.mulf %50, %15 : vector<8x128xf32>
    %52 = math.tanh %51 : vector<8x128xf32>
    %cst_18 = arith.constant 5.000000e-01 : f32
    %53 = vector.broadcast %cst_18 : f32 to vector<8x128xf32>
    %54 = arith.mulf %53, %52 : vector<8x128xf32>
    %cst_19 = arith.constant 5.000000e-01 : f32
    %55 = vector.broadcast %cst_19 : f32 to vector<8x128xf32>
    %56 = arith.addf %54, %55 : vector<8x128xf32>
    %57 = arith.select %12, %52, %56 : vector<8x128xi1>, vector<8x128xf32>
    %58 = vector.extract_strided_slice %57 {offsets = [0, 0], sizes = [8, 32], strides = [1, 1]} : vector<8x128xf32> to vector<8x32xf32>
    %59 = vector.extract_strided_slice %57 {offsets = [0, 32], sizes = [8, 32], strides = [1, 1]} : vector<8x128xf32> to vector<8x32xf32>
    %60 = vector.extract_strided_slice %57 {offsets = [0, 64], sizes = [8, 32], strides = [1, 1]} : vector<8x128xf32> to vector<8x32xf32>
    %61 = vector.extract_strided_slice %57 {offsets = [0, 96], sizes = [8, 32], strides = [1, 1]} : vector<8x128xf32> to vector<8x32xf32>
    %62 = arith.mulf %59, %45 : vector<8x32xf32>
    %63 = arith.mulf %58, %60 : vector<8x32xf32>
    %64 = arith.addf %62, %63 : vector<8x32xf32>
    %65 = math.tanh %64 : vector<8x32xf32>
    %66 = arith.mulf %61, %65 : vector<8x32xf32>
    %c16 = arith.constant 16 : index
    %c0_20 = arith.constant 0 : index
    %67 = vector.load %arg7[%c16, %c0_20] : memref<64x32xf32, #tpu.memory_space<vmem>>, vector<8x32xf32>
    tpu.vector_store %arg7[%c16, %c0_20], %66 {strides = array<i32>} : memref<64x32xf32, #tpu.memory_space<vmem>>, vector<8x32xf32>,
    %cst_21 = arith.constant dense<0.000000e+00> : vector<8x128xf32>
    %68 = tpu.matmul %66, %0, %cst_21 {dimension_numbers = #tpu.dot_dimension_numbers<[1], [0], [0], [1], [0, 0, 1, 1], [], []>} : vector<8x32xf32>, vector<32x128xf32>, vector<8x128xf32> -> vector<8x128xf32>
    %69 = arith.addf %6, %68 : vector<8x128xf32>
    %70 = arith.mulf %69, %15 : vector<8x128xf32>
    %71 = math.tanh %70 : vector<8x128xf32>
    %cst_22 = arith.constant 5.000000e-01 : f32
    %72 = vector.broadcast %cst_22 : f32 to vector<8x128xf32>
    %73 = arith.mulf %72, %71 : vector<8x128xf32>
    %cst_23 = arith.constant 5.000000e-01 : f32
    %74 = vector.broadcast %cst_23 : f32 to vector<8x128xf32>
    %75 = arith.addf %73, %74 : vector<8x128xf32>
    %76 = arith.select %12, %71, %75 : vector<8x128xi1>, vector<8x128xf32>
    %77 = vector.extract_strided_slice %76 {offsets = [0, 0], sizes = [8, 32], strides = [1, 1]} : vector<8x128xf32> to vector<8x32xf32>
    %78 = vector.extract_strided_slice %76 {offsets = [0, 32], sizes = [8, 32], strides = [1, 1]} : vector<8x128xf32> to vector<8x32xf32>
    %79 = vector.extract_strided_slice %76 {offsets = [0, 64], sizes = [8, 32], strides = [1, 1]} : vector<8x128xf32> to vector<8x32xf32>
    %80 = vector.extract_strided_slice %76 {offsets = [0, 96], sizes = [8, 32], strides = [1, 1]} : vector<8x128xf32> to vector<8x32xf32>
    %81 = arith.mulf %78, %64 : vector<8x32xf32>
    %82 = arith.mulf %77, %79 : vector<8x32xf32>
    %83 = arith.addf %81, %82 : vector<8x32xf32>
    %84 = math.tanh %83 : vector<8x32xf32>
    %85 = arith.mulf %80, %84 : vector<8x32xf32>
    %c24 = arith.constant 24 : index
    %c0_24 = arith.constant 0 : index
    %86 = vector.load %arg7[%c24, %c0_24] : memref<64x32xf32, #tpu.memory_space<vmem>>, vector<8x32xf32>
    tpu.vector_store %arg7[%c24, %c0_24], %85 {strides = array<i32>} : memref<64x32xf32, #tpu.memory_space<vmem>>, vector<8x32xf32>,
    %cst_25 = arith.constant dense<0.000000e+00> : vector<8x128xf32>
    %87 = tpu.matmul %85, %0, %cst_25 {dimension_numbers = #tpu.dot_dimension_numbers<[1], [0], [0], [1], [0, 0, 1, 1], [], []>} : vector<8x32xf32>, vector<32x128xf32>, vector<8x128xf32> -> vector<8x128xf32>
    %88 = arith.addf %6, %87 : vector<8x128xf32>
    %89 = arith.mulf %88, %15 : vector<8x128xf32>
    %90 = math.tanh %89 : vector<8x128xf32>
    %cst_26 = arith.constant 5.000000e-01 : f32
    %91 = vector.broadcast %cst_26 : f32 to vector<8x128xf32>
    %92 = arith.mulf %91, %90 : vector<8x128xf32>
    %cst_27 = arith.constant 5.000000e-01 : f32
    %93 = vector.broadcast %cst_27 : f32 to vector<8x128xf32>
    %94 = arith.addf %92, %93 : vector<8x128xf32>
    %95 = arith.select %12, %90, %94 : vector<8x128xi1>, vector<8x128xf32>
    %96 = vector.extract_strided_slice %95 {offsets = [0, 0], sizes = [8, 32], strides = [1, 1]} : vector<8x128xf32> to vector<8x32xf32>
    %97 = vector.extract_strided_slice %95 {offsets = [0, 32], sizes = [8, 32], strides = [1, 1]} : vector<8x128xf32> to vector<8x32xf32>
    %98 = vector.extract_strided_slice %95 {offsets = [0, 64], sizes = [8, 32], strides = [1, 1]} : vector<8x128xf32> to vector<8x32xf32>
    %99 = vector.extract_strided_slice %95 {offsets = [0, 96], sizes = [8, 32], strides = [1, 1]} : vector<8x128xf32> to vector<8x32xf32>
    %100 = arith.mulf %97, %83 : vector<8x32xf32>
    %101 = arith.mulf %96, %98 : vector<8x32xf32>
    %102 = arith.addf %100, %101 : vector<8x32xf32>
    %103 = math.tanh %102 : vector<8x32xf32>
    %104 = arith.mulf %99, %103 : vector<8x32xf32>
    %c32 = arith.constant 32 : index
    %c0_28 = arith.constant 0 : index
    %105 = vector.load %arg7[%c32, %c0_28] : memref<64x32xf32, #tpu.memory_space<vmem>>, vector<8x32xf32>
    tpu.vector_store %arg7[%c32, %c0_28], %104 {strides = array<i32>} : memref<64x32xf32, #tpu.memory_space<vmem>>, vector<8x32xf32>,
    %cst_29 = arith.constant dense<0.000000e+00> : vector<8x128xf32>
    %106 = tpu.matmul %104, %0, %cst_29 {dimension_numbers = #tpu.dot_dimension_numbers<[1], [0], [0], [1], [0, 0, 1, 1], [], []>} : vector<8x32xf32>, vector<32x128xf32>, vector<8x128xf32> -> vector<8x128xf32>
    %107 = arith.addf %6, %106 : vector<8x128xf32>
    %108 = arith.mulf %107, %15 : vector<8x128xf32>
    %109 = math.tanh %108 : vector<8x128xf32>
    %cst_30 = arith.constant 5.000000e-01 : f32
    %110 = vector.broadcast %cst_30 : f32 to vector<8x128xf32>
    %111 = arith.mulf %110, %109 : vector<8x128xf32>
    %cst_31 = arith.constant 5.000000e-01 : f32
    %112 = vector.broadcast %cst_31 : f32 to vector<8x128xf32>
    %113 = arith.addf %111, %112 : vector<8x128xf32>
    %114 = arith.select %12, %109, %113 : vector<8x128xi1>, vector<8x128xf32>
    %115 = vector.extract_strided_slice %114 {offsets = [0, 0], sizes = [8, 32], strides = [1, 1]} : vector<8x128xf32> to vector<8x32xf32>
    %116 = vector.extract_strided_slice %114 {offsets = [0, 32], sizes = [8, 32], strides = [1, 1]} : vector<8x128xf32> to vector<8x32xf32>
    %117 = vector.extract_strided_slice %114 {offsets = [0, 64], sizes = [8, 32], strides = [1, 1]} : vector<8x128xf32> to vector<8x32xf32>
    %118 = vector.extract_strided_slice %114 {offsets = [0, 96], sizes = [8, 32], strides = [1, 1]} : vector<8x128xf32> to vector<8x32xf32>
    %119 = arith.mulf %116, %102 : vector<8x32xf32>
    %120 = arith.mulf %115, %117 : vector<8x32xf32>
    %121 = arith.addf %119, %120 : vector<8x32xf32>
    %122 = math.tanh %121 : vector<8x32xf32>
    %123 = arith.mulf %118, %122 : vector<8x32xf32>
    %c40 = arith.constant 40 : index
    %c0_32 = arith.constant 0 : index
    %124 = vector.load %arg7[%c40, %c0_32] : memref<64x32xf32, #tpu.memory_space<vmem>>, vector<8x32xf32>
    tpu.vector_store %arg7[%c40, %c0_32], %123 {strides = array<i32>} : memref<64x32xf32, #tpu.memory_space<vmem>>, vector<8x32xf32>,
    %cst_33 = arith.constant dense<0.000000e+00> : vector<8x128xf32>
    %125 = tpu.matmul %123, %0, %cst_33 {dimension_numbers = #tpu.dot_dimension_numbers<[1], [0], [0], [1], [0, 0, 1, 1], [], []>} : vector<8x32xf32>, vector<32x128xf32>, vector<8x128xf32> -> vector<8x128xf32>
    %126 = arith.addf %6, %125 : vector<8x128xf32>
    %127 = arith.mulf %126, %15 : vector<8x128xf32>
    %128 = math.tanh %127 : vector<8x128xf32>
    %cst_34 = arith.constant 5.000000e-01 : f32
    %129 = vector.broadcast %cst_34 : f32 to vector<8x128xf32>
    %130 = arith.mulf %129, %128 : vector<8x128xf32>
    %cst_35 = arith.constant 5.000000e-01 : f32
    %131 = vector.broadcast %cst_35 : f32 to vector<8x128xf32>
    %132 = arith.addf %130, %131 : vector<8x128xf32>
    %133 = arith.select %12, %128, %132 : vector<8x128xi1>, vector<8x128xf32>
    %134 = vector.extract_strided_slice %133 {offsets = [0, 0], sizes = [8, 32], strides = [1, 1]} : vector<8x128xf32> to vector<8x32xf32>
    %135 = vector.extract_strided_slice %133 {offsets = [0, 32], sizes = [8, 32], strides = [1, 1]} : vector<8x128xf32> to vector<8x32xf32>
    %136 = vector.extract_strided_slice %133 {offsets = [0, 64], sizes = [8, 32], strides = [1, 1]} : vector<8x128xf32> to vector<8x32xf32>
    %137 = vector.extract_strided_slice %133 {offsets = [0, 96], sizes = [8, 32], strides = [1, 1]} : vector<8x128xf32> to vector<8x32xf32>
    %138 = arith.mulf %135, %121 : vector<8x32xf32>
    %139 = arith.mulf %134, %136 : vector<8x32xf32>
    %140 = arith.addf %138, %139 : vector<8x32xf32>
    %141 = math.tanh %140 : vector<8x32xf32>
    %142 = arith.mulf %137, %141 : vector<8x32xf32>
    %c48 = arith.constant 48 : index
    %c0_36 = arith.constant 0 : index
    %143 = vector.load %arg7[%c48, %c0_36] : memref<64x32xf32, #tpu.memory_space<vmem>>, vector<8x32xf32>
    tpu.vector_store %arg7[%c48, %c0_36], %142 {strides = array<i32>} : memref<64x32xf32, #tpu.memory_space<vmem>>, vector<8x32xf32>,
    %cst_37 = arith.constant dense<0.000000e+00> : vector<8x128xf32>
    %144 = tpu.matmul %142, %0, %cst_37 {dimension_numbers = #tpu.dot_dimension_numbers<[1], [0], [0], [1], [0, 0, 1, 1], [], []>} : vector<8x32xf32>, vector<32x128xf32>, vector<8x128xf32> -> vector<8x128xf32>
    %145 = arith.addf %6, %144 : vector<8x128xf32>
    %146 = arith.mulf %145, %15 : vector<8x128xf32>
    %147 = math.tanh %146 : vector<8x128xf32>
    %cst_38 = arith.constant 5.000000e-01 : f32
    %148 = vector.broadcast %cst_38 : f32 to vector<8x128xf32>
    %149 = arith.mulf %148, %147 : vector<8x128xf32>
    %cst_39 = arith.constant 5.000000e-01 : f32
    %150 = vector.broadcast %cst_39 : f32 to vector<8x128xf32>
    %151 = arith.addf %149, %150 : vector<8x128xf32>
    %152 = arith.select %12, %147, %151 : vector<8x128xi1>, vector<8x128xf32>
    %153 = vector.extract_strided_slice %152 {offsets = [0, 0], sizes = [8, 32], strides = [1, 1]} : vector<8x128xf32> to vector<8x32xf32>
    %154 = vector.extract_strided_slice %152 {offsets = [0, 32], sizes = [8, 32], strides = [1, 1]} : vector<8x128xf32> to vector<8x32xf32>
    %155 = vector.extract_strided_slice %152 {offsets = [0, 64], sizes = [8, 32], strides = [1, 1]} : vector<8x128xf32> to vector<8x32xf32>
    %156 = vector.extract_strided_slice %152 {offsets = [0, 96], sizes = [8, 32], strides = [1, 1]} : vector<8x128xf32> to vector<8x32xf32>
    %157 = arith.mulf %154, %140 : vector<8x32xf32>
    %158 = arith.mulf %153, %155 : vector<8x32xf32>
    %159 = arith.addf %157, %158 : vector<8x32xf32>
    %160 = math.tanh %159 : vector<8x32xf32>
    %161 = arith.mulf %156, %160 : vector<8x32xf32>
    %c56 = arith.constant 56 : index
    %c0_40 = arith.constant 0 : index
    %162 = vector.load %arg7[%c56, %c0_40] : memref<64x32xf32, #tpu.memory_space<vmem>>, vector<8x32xf32>
    tpu.vector_store %arg7[%c56, %c0_40], %161 {strides = array<i32>} : memref<64x32xf32, #tpu.memory_space<vmem>>, vector<8x32xf32>,
    %c0_41 = arith.constant 0 : index
    %c0_42 = arith.constant 0 : index
    %163 = vector.load %arg7[%c0_41, %c0_42] : memref<64x32xf32, #tpu.memory_space<vmem>>, vector<64x32xf32>
    %c0_43 = arith.constant 0 : index
    %c0_44 = arith.constant 0 : index
    %164 = vector.load %arg4[%c0_43, %c0_44] : memref<32x128xf32, #tpu.memory_space<vmem>>, vector<32x128xf32>
    %cst_45 = arith.constant dense<0.000000e+00> : vector<64x128xf32>
    %165 = tpu.matmul %163, %164, %cst_45 {dimension_numbers = #tpu.dot_dimension_numbers<[1], [0], [0], [1], [0, 0, 1, 1], [], []>} : vector<64x32xf32>, vector<32x128xf32>, vector<64x128xf32> -> vector<64x128xf32>
    %c0_46 = arith.constant 0 : index
    %c0_47 = arith.constant 0 : index
    %166 = vector.load %arg5[%c0_46, %c0_47] : memref<1x128xf32, #tpu.memory_space<vmem>>, vector<1x128xf32>
    %167 = vector.broadcast %166 : vector<1x128xf32> to vector<64x128xf32>
    %168 = arith.addf %165, %167 : vector<64x128xf32>
    %c0_48 = arith.constant 0 : index
    %c0_49 = arith.constant 0 : index
    %169 = vector.load %arg6[%c0_48, %c0_49] : memref<64x128xf32, #tpu.memory_space<vmem>>, vector<64x128xf32>
    tpu.vector_store %arg6[%c0_48, %c0_49], %168 {strides = array<i32>} : memref<64x128xf32, #tpu.memory_space<vmem>>, vector<64x128xf32>,
    return
  }
}

</mosaic_0001>

<bundles_post_ra>
// kernel: decoder_forward.1
= control target key start
LH: loop header
LB: loop body
LE: loop exit
PB: predicated region body
PF: predicated region fallthrough
CT: control target
= control target key end

     0   :  { %11 = vsyncpa [#allocation4], 0  ;;  %s917_s0 = inlined_call_operand.vmem [shape: f32[8,16], index: 0, kind: input, shape index: {}]   ;;  %s918_s1 = inlined_call_operand.hbm [shape: f32[16,128], index: 1, kind: input, shape index: {}]   ;;  %s919_s2 = inlined_call_operand.hbm [shape: f32[32,128], index: 2, kind: input, shape index: {}]   ;;  %s920_s3 = inlined_call_operand.vmem [shape: f32[1,128], index: 3, kind: input, shape index: {}]   ;;  %s921_s4 = inlined_call_operand.hbm [shape: f32[32,128], index: 4, kind: input, shape index: {}]   ;;  %s922_s5 = inlined_call_operand.vmem [shape: f32[1,128], index: 5, kind: input, shape index: {}]   ;;  %s923_s6 = inlined_call_operand.vmem [shape: f32[64,128], index: 6, kind: output, shape index: {}]  }
   0x1   :  { %12 = vsyncpa [#allocation6], 0  ;;  %s32_s23 = sshll.u32 %s919_s2, 4  ;;  %s725_s24 = smov [#allocation5]   ;;  %s33_s23 = int_to_ptr.hbm [resolvable:$true] %s32_s23 }
   0x2   :  { %s34_s25 = sshll.u32 %s725_s24, 4  ;;  %s19_s28 = sshll.u32 %s918_s1, 4  ;;  %s35_s25 = int_to_ptr.vmem [resolvable:$true] %s34_s25  ;;  %s20_s28 = int_to_ptr.hbm [resolvable:$true] %s19_s28 }
   0x3   :  { %s726_s29 = smov 128   ;;  %s727_s30 = smov 8  }
   0x4   :  { %40 = dma.hbm_to_vmem [thread:$0]  %s33_s23, 512, %s35_s25, [#allocation6], %s726_s29, %s726_s29, %s727_s30  }
   0x5   :  { %s728_s7 = smov [#allocation3]   ;;  %s47_s11 = sshll.u32 %s921_s4, 4  ;;  %s48_s11 = int_to_ptr.hbm [resolvable:$true] %s47_s11 }
   0x6   :  { %s21_s8 = sshll.u32 %s728_s7, 4  ;;  %s729_s2 = smov [#allocation7]   ;;  %s22_s8 = int_to_ptr.vmem [resolvable:$true] %s21_s8 }
   0x7   :  { %27 = dma.hbm_to_vmem [thread:$0]  %s20_s28, 256, %s22_s8, [#allocation4], %s726_s29, %s726_s29, %s727_s30  }
   0x8   :  { %s49_s12 = sshll.u32 %s729_s2, 4  ;;  %s50_s12 = int_to_ptr.vmem [resolvable:$true] %s49_s12 }
   0x9   :  { %55 = dma.hbm_to_vmem [thread:$0]  %s48_s11, 512, %s50_s12, [#allocation6], %s726_s29, %s726_s29, %s727_s30  }
   0xa   :  { %721 = dma.done.wait [#allocation4], 256  }
   0xb   :  { %722 = vsyncadd [#allocation4], 4294967040 }
   0xc   :  { %723 = dma.done.wait [#allocation6], 1024  }
   0xd   :  { %724 = vsyncadd [#allocation6], 4294966272  ;;  %v76_v0 = vld [vmem:[#allocation3 + $0x8] sm:$0xff]  ;;  %v75_v1 = vld [vmem:[#allocation3] sm:$0xff]  ;;  %vm81_vm0 = vcmask 130048   ;;  %v105_v3 = vlaneseq  ;;  %v730_v8 = vmov 0.5  }
   0xe   :  { %99 = vmatpush.msra.mxu3 %v76_v0  ;;  %v74_v2 = vld [vmem:[%s917_s0] sm:$0xff]  ;;  %s731_s0 = smov 64   ;;  %s733_s15 = smov 96   ;;  %v73_v19 = vld [vmem:[#allocation5 + $0x18] sm:$0xff]  ;;  %v71_v21 = vld [vmem:[#allocation5 + $0x8] sm:$0xff]  ;;  %vm131_vm4 = vcmask 261120  }
   0xf   :  { %v106_v4 = vand.u32 127, %v105_v3  ;;  %v615_v5 = vld [vmem:[%s920_s3] ss:$0 sm:$0xff]  ;;  %s732_s3 = smov 32   ;;  %147 = vmatpush.msra.mxu1 %v73_v19  ;;  %301 = vmatpush.msra.mxu0 %v73_v19  ;;  %v70_v24 = vld [vmem:[#allocation5] sm:$0xff] }
  0x10   :  { %100 = vmatpush.msra.mxu3 %v75_v1  ;;  %v72_v20 = vld [vmem:[#allocation5 + $0x10] sm:$0xff]  ;;  %401 = vmatpush.msra.mxu2 %v73_v19 }
  0x11   :  { %582 = vmatmul.msk.f32.vlgmr.msra.gmra.mxu3 %vm81_vm0, %v74_v2  ;;  %vm107_vm1 = vcmp.ge.s32.totalorder %v106_v4, 64  ;;  %vm108_vm2 = vcmp.lt.s32.totalorder %v106_v4, 96  ;;  %148 = vmatpush.msra.mxu1 %v72_v20 }
  0x12   :  { %vm784_vm3 = vmand %vm107_vm1, %vm108_vm2  ;;  %201 = vmatpush.msrb.mxu3 %v73_v19  ;;  %302 = vmatpush.msra.mxu0 %v72_v20 }
  0x13   :  { %v790_v9 = vsel %vm784_vm3, 1.0, %v730_v8  ;;  %402 = vmatpush.msra.mxu2 %v72_v20  ;;  %149 = vmatpush.msra.mxu1 %v71_v21 }
  0x14   :  { %202 = vmatpush.msrb.mxu3 %v72_v20  ;;  %303 = vmatpush.msra.mxu0 %v71_v21 }
  0x15   :  { %403 = vmatpush.msra.mxu2 %v71_v21  ;;  %150 = vmatpush.msra.mxu1 %v70_v24 }
  0x16   :  { %203 = vmatpush.msrb.mxu3 %v71_v21  ;;  %304 = vmatpush.msra.mxu0 %v70_v24 }
  0x17   :  { %351 = vmatpush.msrb.mxu1 %v73_v19  ;;  %404 = vmatpush.msra.mxu2 %v70_v24 }
  0x18   :  { %204 = vmatpush.msrb.mxu3 %v70_v24 }
  0x19   :  { %352 = vmatpush.msrb.mxu1 %v72_v20 }
  0x1a   :  { %251 = vmatpush.msra.mxu3 %v73_v19 }
  0x1b   :  { %353 = vmatpush.msrb.mxu1 %v71_v21 }
  0x1c   :  { %252 = vmatpush.msra.mxu3 %v72_v20 }
  0x1d   :  { %354 = vmatpush.msrb.mxu1 %v70_v24 }
  0x1e   :  { %253 = vmatpush.msra.mxu3 %v71_v21 }
  0x20   :  { %254 = vmatpush.msra.mxu3 %v70_v24 }
  0x94   :  { %v102_v7 = vpop.f32.mrf.mxu3 }
  0x95   :  { %v792_v10 = vadd.f32 %v615_v5, %v102_v7 }
  0x97   :  { %v111_v11 = vmul.f32 %v790_v9, %v792_v10 }
  0x99   :  { %617 = vtanh.f32 %v111_v11 }
  0x9f   :  { %v618_v12 = vpop.eup %617 }
  0xa0   :  { %v113_v13 = vmul.f32 0.5, %v618_v12 }
  0xa2   :  { %v114_v14 = vadd.f32 0.5, %v113_v13  ;;  %v498_v13 = vld [vmem:[#allocation7 + $0x18] sm:$0xff] }
  0xa3   :  { %539 = vmatpush.msrb.mxu0 %v498_v13  ;;  %599 = vmatpush.msrb.mxu2 %v498_v13 }
  0xa4   :  { %v115_v15 = vsel %vm784_vm3, %v618_v12, %v114_v14  ;;  %v497_v14 = vld [vmem:[#allocation7 + $0x10] sm:$0xff] }
  0xa5   :  { %117 = vrot.lane.b32.xlu0 %v115_v15, %s731_s0  ;;  %540 = vmatpush.msrb.mxu0 %v497_v14 }
  0xa6   :  { %601 = vmatpush.msrb.mxu2 %v497_v14 }
 0x117   :  { %v118_v16 = vpop.permute.xlu0 %117 }
 0x118   :  { %v120_v17 = vmul.f32 %v118_v16, %v115_v15  ;;  %v495_v16 = vld [vmem:[#allocation7] sm:$0xff] }
 0x11a   :  { %619 = vtanh.f32 %v120_v17  ;;  %162 = vrot.lane.b32.xlu2 %v120_v17, %s732_s3 }
 0x120   :  { %v620_v18 = vpop.eup %619 }
 0x121   :  { %123 = vrot.lane.b32.xlu0 %v620_v18, %s733_s15 }
 0x174   :  { %v163_v35 = vpop.permute.xlu2 %162 }
 0x193   :  { %v124_v22 = vpop.permute.xlu0 %123 }
 0x194   :  { %v126_v23 = vmul.f32 %v124_v22, %v115_v15  ;;  %v496_v15 = vld [vmem:[#allocation7 + $0x8] sm:$0xff] }
 0x195   :  { %541 = vmatpush.msrb.mxu0 %v496_v15  ;;  %603 = vmatpush.msrb.mxu2 %v496_v15 }
 0x196   :  { %128 = vrot.lane.b32.xlu1 %v126_v23, %s732_s3 }
 0x197   :  { %542 = vmatpush.msrb.mxu0 %v495_v16  ;;  %605 = vmatpush.msrb.mxu2 %v495_v16 }
 0x208   :  { %v129_v25 = vpop.permute.xlu1 %128 }
 0x209   :  { %132 = vst.msk [vmem:[#allocation2] sm:$0xff] %vm131_vm4, %v129_v25  ;;  %583 = vmatmul.msk.f32.vlgmr.msra.gmra.mxu1 %vm131_vm4, %v129_v25 }
 0x20a   :  { %598 = vmatpush.msra.mxu1 %v498_v13 }
 0x20c   :  { %600 = vmatpush.msra.mxu1 %v497_v14 }
 0x20e   :  { %602 = vmatpush.msra.mxu1 %v496_v15 }
 0x210   :  { %604 = vmatpush.msra.mxu1 %v495_v16  ;;  %v487_v18 = vld [vmem:[#allocation2] sm:$0xff] }
 0x286   :  { %v152_v26 = vpop.f32.mrf.mxu1 }
 0x287   :  { %v155_v27 = vadd.f32 %v152_v26, %v792_v10 }
 0x289   :  { %v156_v28 = vmul.f32 %v155_v27, %v790_v9 }
 0x28b   :  { %621 = vtanh.f32 %v156_v28 }
 0x291   :  { %v622_v29 = vpop.eup %621 }
 0x292   :  { %v158_v30 = vmul.f32 0.5, %v622_v29 }
 0x294   :  { %v159_v31 = vadd.f32 0.5, %v158_v30 }
 0x296   :  { %v160_v32 = vsel %vm784_vm3, %v622_v29, %v159_v31 }
 0x297   :  { %167 = vrot.lane.b32.xlu1 %v160_v32, %s731_s0  ;;  %v165_v36 = vmul.f32 %v163_v35, %v160_v32 }
 0x309   :  { %v168_v33 = vpop.permute.xlu1 %167 }
 0x30a   :  { %v170_v34 = vmul.f32 %v168_v33, %v160_v32 }
 0x30c   :  { %172 = vrot.lane.b32.xlu2 %v170_v34, %s732_s3 }
 0x366   :  { %v173_v37 = vpop.permute.xlu2 %172 }
 0x367   :  { %v175_v38 = vadd.f32 %v173_v37, %v165_v36 }
 0x369   :  { %623 = vtanh.f32 %v175_v38 }
 0x36f   :  { %v624_v39 = vpop.eup %623 }
 0x370   :  { %178 = vrot.lane.b32.xlu0 %v624_v39, %s731_s0 }
 0x3e2   :  { %v179_v40 = vpop.permute.xlu0 %178 }
 0x3e3   :  { %v181_v41 = vmul.f32 %v179_v40, %v160_v32 }
 0x3e5   :  { %183 = vrot.lane.b32.xlu1 %v181_v41, %s732_s3 }
 0x457   :  { %v184_v42 = vpop.permute.xlu1 %183 }
 0x458   :  { %186 = vst.msk [vmem:[#allocation2 + $0x8] sm:$0xff] %vm131_vm4, %v184_v42  ;;  %584 = vmatmul.msk.f32.vlgmr.msrb.gmra.mxu3 %vm131_vm4, %v184_v42 }
 0x459   :  { %451 = vmatpush.msrb.mxu3 %v73_v19 }
 0x45b   :  { %452 = vmatpush.msrb.mxu3 %v72_v20 }
 0x45d   :  { %453 = vmatpush.msrb.mxu3 %v71_v21 }
 0x45f   :  { %454 = vmatpush.msrb.mxu3 %v70_v24  ;;  %v488_v19 = vld [vmem:[#allocation2 + $0x8] sm:$0xff]  ;;  %v841_v24 = vld [vmem:[%s922_s5] ss:$0 sm:$0xff] }
 0x4db   :  { %v206_v43 = vpop.f32.mrf.mxu3 }
 0x4dc   :  { %v209_v44 = vadd.f32 %v206_v43, %v792_v10 }
 0x4de   :  { %v210_v45 = vmul.f32 %v209_v44, %v790_v9 }
 0x4e0   :  { %625 = vtanh.f32 %v210_v45 }
 0x4e6   :  { %v626_v46 = vpop.eup %625 }
 0x4e7   :  { %v212_v47 = vmul.f32 0.5, %v626_v46 }
 0x4e9   :  { %v213_v48 = vadd.f32 0.5, %v212_v47 }
 0x4eb   :  { %v214_v49 = vsel %vm784_vm3, %v626_v46, %v213_v48 }
 0x4ec   :  { %217 = vrot.lane.b32.xlu2 %v214_v49, %s731_s0  ;;  %v215_v52 = vmul.f32 %v214_v49, %v175_v38 }
 0x546   :  { %v218_v50 = vpop.permute.xlu2 %217 }
 0x547   :  { %v220_v51 = vmul.f32 %v218_v50, %v214_v49 }
 0x549   :  { %222 = vrot.lane.b32.xlu0 %v220_v51, %s732_s3 }
 0x5bb   :  { %v223_v53 = vpop.permute.xlu0 %222 }
 0x5bc   :  { %v225_v54 = vadd.f32 %v223_v53, %v215_v52 }
 0x5be   :  { %627 = vtanh.f32 %v225_v54 }
 0x5c4   :  { %v628_v55 = vpop.eup %627 }
 0x5c5   :  { %228 = vrot.lane.b32.xlu1 %v628_v55, %s731_s0 }
 0x637   :  { %v229_v56 = vpop.permute.xlu1 %228 }
 0x638   :  { %v231_v57 = vmul.f32 %v229_v56, %v214_v49 }
 0x63a   :  { %233 = vrot.lane.b32.xlu2 %v231_v57, %s732_s3 }
 0x694   :  { %v234_v58 = vpop.permute.xlu2 %233 }
 0x695   :  { %236 = vst.msk [vmem:[#allocation2 + $0x10] sm:$0xff] %vm131_vm4, %v234_v58  ;;  %585 = vmatmul.msk.f32.vlgmr.msra.gmra.mxu3 %vm131_vm4, %v234_v58 }
 0x69c   :  { %v489_v20 = vld [vmem:[#allocation2 + $0x10] sm:$0xff] }
 0x718   :  { %v256_v59 = vpop.f32.mrf.mxu3 }
 0x719   :  { %v259_v60 = vadd.f32 %v256_v59, %v792_v10 }
 0x71b   :  { %v260_v61 = vmul.f32 %v259_v60, %v790_v9 }
 0x71d   :  { %629 = vtanh.f32 %v260_v61 }
 0x723   :  { %v630_v62 = vpop.eup %629 }
 0x724   :  { %v262_v63 = vmul.f32 0.5, %v630_v62 }
 0x726   :  { %v263_v0 = vadd.f32 0.5, %v262_v63 }
 0x728   :  { %v264_v1 = vsel %vm784_vm3, %v630_v62, %v263_v0 }
 0x729   :  { %267 = vrot.lane.b32.xlu0 %v264_v1, %s731_s0  ;;  %v265_v4 = vmul.f32 %v264_v1, %v225_v54 }
 0x79b   :  { %v268_v2 = vpop.permute.xlu0 %267 }
 0x79c   :  { %v270_v3 = vmul.f32 %v268_v2, %v264_v1 }
 0x79e   :  { %272 = vrot.lane.b32.xlu1 %v270_v3, %s732_s3 }
 0x810   :  { %v273_v5 = vpop.permute.xlu1 %272 }
 0x811   :  { %v275_v7 = vadd.f32 %v273_v5, %v265_v4 }
 0x813   :  { %631 = vtanh.f32 %v275_v7 }
 0x819   :  { %v632_v8 = vpop.eup %631 }
 0x81a   :  { %278 = vrot.lane.b32.xlu2 %v632_v8, %s731_s0 }
 0x874   :  { %v279_v11 = vpop.permute.xlu2 %278 }
 0x875   :  { %v281_v12 = vmul.f32 %v279_v11, %v264_v1 }
 0x877   :  { %283 = vrot.lane.b32.xlu0 %v281_v12, %s732_s3 }
 0x8e9   :  { %v284_v17 = vpop.permute.xlu0 %283 }
 0x8ea   :  { %286 = vst.msk [vmem:[#allocation2 + $0x18] sm:$0xff] %vm131_vm4, %v284_v17  ;;  %586 = vmatmul.msk.f32.vlgmr.msra.gmra.mxu0 %vm131_vm4, %v284_v17 }
 0x8f1   :  { %v490_v44 = vld [vmem:[#allocation2 + $0x18] sm:$0xff] }
 0x8f2   :  { %590 = vmatmul.msk.f32.vlgmr.msrb.gmra.mxu0 %vm131_vm4, %v487_v18 }
 0x8fa   :  { %591 = vmatmul.msk.f32.gmra.mxu0 %vm131_vm4, %v488_v19 }
 0x902   :  { %592 = vmatmul.msk.f32.gmra.mxu0 %vm131_vm4, %v489_v20 }
 0x967   :  { %v306_v21 = vpop.f32.mrf.mxu0 }
 0x968   :  { %v309_v22 = vadd.f32 %v306_v21, %v792_v10 }
 0x96a   :  { %v310_v23 = vmul.f32 %v309_v22, %v790_v9 }
 0x96c   :  { %633 = vtanh.f32 %v310_v23 }
 0x96f   :  { %v544_v25 = vpop.f32.mrf.mxu0 }
 0x970   :  { %v545_v26 = vadd.f32 %v841_v24, %v544_v25 }
 0x972   :  { %v634_v27 = vpop.eup %633  ;;  %568 = vst [vmem:[%s923_s6] sm:$0xff] %v545_v26 }
 0x973   :  { %v312_v28 = vmul.f32 0.5, %v634_v27 }
 0x975   :  { %v313_v29 = vadd.f32 0.5, %v312_v28 }
 0x977   :  { %v547_v30 = vpop.f32.mrf.mxu0  ;;  %v314_v31 = vsel %vm784_vm3, %v634_v27, %v313_v29 }
 0x978   :  { %v548_v32 = vadd.f32 %v841_v24, %v547_v30  ;;  %317 = vrot.lane.b32.xlu1 %v314_v31, %s731_s0  ;;  %v315_v37 = vmul.f32 %v314_v31, %v275_v7 }
 0x97a   :  { %569 = vst [vmem:[%s923_s6 + $0x8] sm:$0xff] %v548_v32 }
 0x97f   :  { %v550_v33 = vpop.f32.mrf.mxu0 }
 0x980   :  { %v551_v34 = vadd.f32 %v841_v24, %v550_v33 }
 0x982   :  { %570 = vst [vmem:[%s923_s6 + $0x10] sm:$0xff] %v551_v34 }
 0x9ea   :  { %v318_v35 = vpop.permute.xlu1 %317 }
 0x9eb   :  { %v320_v36 = vmul.f32 %v318_v35, %v314_v31 }
 0x9ed   :  { %322 = vrot.lane.b32.xlu2 %v320_v36, %s732_s3 }
 0xa47   :  { %v323_v38 = vpop.permute.xlu2 %322 }
 0xa48   :  { %v325_v39 = vadd.f32 %v323_v38, %v315_v37 }
 0xa4a   :  { %635 = vtanh.f32 %v325_v39 }
 0xa50   :  { %v636_v40 = vpop.eup %635 }
 0xa51   :  { %328 = vrot.lane.b32.xlu0 %v636_v40, %s731_s0 }
 0xac3   :  { %v329_v41 = vpop.permute.xlu0 %328 }
 0xac4   :  { %v331_v42 = vmul.f32 %v329_v41, %v314_v31 }
 0xac6   :  { %333 = vrot.lane.b32.xlu1 %v331_v42, %s732_s3 }
 0xb38   :  { %v334_v43 = vpop.permute.xlu1 %333 }
 0xb39   :  { %336 = vst.msk [vmem:[#allocation2 + $0x20] sm:$0xff] %vm131_vm4, %v334_v43  ;;  %587 = vmatmul.msk.f32.vlgmr.msrb.gmra.mxu1 %vm131_vm4, %v334_v43 }
 0xb40   :  { %v491_v45 = vld [vmem:[#allocation2 + $0x20] sm:$0xff] }
 0xb41   :  { %593 = vmatmul.msk.f32.vlgmr.msra.gmra.mxu1 %vm131_vm4, %v490_v44 }
 0xb49   :  { %594 = vmatmul.msk.f32.gmra.mxu1 %vm131_vm4, %v491_v45 }
 0xbb6   :  { %v356_v46 = vpop.f32.mrf.mxu1 }
 0xbb7   :  { %v359_v47 = vadd.f32 %v356_v46, %v792_v10 }
 0xbb9   :  { %v360_v48 = vmul.f32 %v359_v47, %v790_v9 }
 0xbbb   :  { %637 = vtanh.f32 %v360_v48 }
 0xbbe   :  { %v553_v49 = vpop.f32.mrf.mxu1 }
 0xbbf   :  { %v554_v50 = vadd.f32 %v841_v24, %v553_v49 }
 0xbc1   :  { %v638_v51 = vpop.eup %637  ;;  %571 = vst [vmem:[%s923_s6 + $0x18] sm:$0xff] %v554_v50 }
 0xbc2   :  { %v362_v52 = vmul.f32 0.5, %v638_v51 }
 0xbc4   :  { %v363_v53 = vadd.f32 0.5, %v362_v52 }
 0xbc6   :  { %v556_v54 = vpop.f32.mrf.mxu1  ;;  %v364_v55 = vsel %vm784_vm3, %v638_v51, %v363_v53 }
 0xbc7   :  { %v557_v56 = vadd.f32 %v841_v24, %v556_v54  ;;  %367 = vrot.lane.b32.xlu2 %v364_v55, %s731_s0  ;;  %v365_v59 = vmul.f32 %v364_v55, %v325_v39 }
 0xbc9   :  { %572 = vst [vmem:[%s923_s6 + $0x20] sm:$0xff] %v557_v56 }
 0xc21   :  { %v368_v57 = vpop.permute.xlu2 %367 }
 0xc22   :  { %v370_v58 = vmul.f32 %v368_v57, %v364_v55 }
 0xc24   :  { %372 = vrot.lane.b32.xlu0 %v370_v58, %s732_s3 }
 0xc96   :  { %v373_v60 = vpop.permute.xlu0 %372 }
 0xc97   :  { %v375_v61 = vadd.f32 %v373_v60, %v365_v59 }
 0xc99   :  { %639 = vtanh.f32 %v375_v61 }
 0xc9f   :  { %v640_v62 = vpop.eup %639 }
 0xca0   :  { %378 = vrot.lane.b32.xlu1 %v640_v62, %s731_s0 }
 0xd12   :  { %v379_v63 = vpop.permute.xlu1 %378 }
 0xd13   :  { %v381_v0 = vmul.f32 %v379_v63, %v364_v55 }
 0xd15   :  { %383 = vrot.lane.b32.xlu2 %v381_v0, %s732_s3 }
 0xd6f   :  { %v384_v1 = vpop.permute.xlu2 %383 }
 0xd70   :  { %386 = vst.msk [vmem:[#allocation2 + $0x28] sm:$0xff] %vm131_vm4, %v384_v1  ;;  %588 = vmatmul.msk.f32.vlgmr.msra.gmra.mxu2 %vm131_vm4, %v384_v1 }
 0xd77   :  { %v492_v2 = vld [vmem:[#allocation2 + $0x28] sm:$0xff] }
 0xd78   :  { %595 = vmatmul.msk.f32.vlgmr.msrb.gmra.mxu2 %vm131_vm4, %v492_v2 }
 0xdf3   :  { %v406_v3 = vpop.f32.mrf.mxu2 }
 0xdf4   :  { %v409_v4 = vadd.f32 %v406_v3, %v792_v10 }
 0xdf6   :  { %v410_v5 = vmul.f32 %v409_v4, %v790_v9 }
 0xdf8   :  { %641 = vtanh.f32 %v410_v5 }
 0xdfb   :  { %v559_v7 = vpop.f32.mrf.mxu2 }
 0xdfc   :  { %v560_v8 = vadd.f32 %v841_v24, %v559_v7 }
 0xdfe   :  { %v642_v11 = vpop.eup %641  ;;  %573 = vst [vmem:[%s923_s6 + $0x28] sm:$0xff] %v560_v8 }
 0xdff   :  { %v412_v12 = vmul.f32 0.5, %v642_v11 }
 0xe01   :  { %v413_v13 = vadd.f32 0.5, %v412_v12 }
 0xe03   :  { %v414_v14 = vsel %vm784_vm3, %v642_v11, %v413_v13 }
 0xe04   :  { %417 = vrot.lane.b32.xlu0 %v414_v14, %s731_s0  ;;  %v415_v17 = vmul.f32 %v414_v14, %v375_v61 }
 0xe76   :  { %v418_v15 = vpop.permute.xlu0 %417 }
 0xe77   :  { %v420_v16 = vmul.f32 %v418_v15, %v414_v14 }
 0xe79   :  { %422 = vrot.lane.b32.xlu1 %v420_v16, %s732_s3 }
 0xeeb   :  { %v423_v18 = vpop.permute.xlu1 %422 }
 0xeec   :  { %v425_v19 = vadd.f32 %v423_v18, %v415_v17 }
 0xeee   :  { %643 = vtanh.f32 %v425_v19 }
 0xef4   :  { %v644_v20 = vpop.eup %643 }
 0xef5   :  { %428 = vrot.lane.b32.xlu2 %v644_v20, %s731_s0 }
 0xf4f   :  { %v429_v21 = vpop.permute.xlu2 %428 }
 0xf50   :  { %v431_v22 = vmul.f32 %v429_v21, %v414_v14 }
 0xf52   :  { %433 = vrot.lane.b32.xlu0 %v431_v22, %s732_s3 }
 0xfc4   :  { %v434_v23 = vpop.permute.xlu0 %433 }
 0xfc5   :  { %436 = vst.msk [vmem:[#allocation2 + $0x30] sm:$0xff] %vm131_vm4, %v434_v23  ;;  %589 = vmatmul.msk.f32.vlgmr.msrb.gmra.mxu3 %vm131_vm4, %v434_v23 }
 0xfcc   :  { %v493_v25 = vld [vmem:[#allocation2 + $0x30] sm:$0xff] }
 0xfcd   :  { %596 = vmatmul.msk.f32.gmra.mxu2 %vm131_vm4, %v493_v25 }
0x1048   :  { %v456_v26 = vpop.f32.mrf.mxu3 }
0x1049   :  { %v459_v27 = vadd.f32 %v456_v26, %v792_v10 }
0x104b   :  { %v460_v28 = vmul.f32 %v459_v27, %v790_v9 }
0x104d   :  { %645 = vtanh.f32 %v460_v28 }
0x1050   :  { %v562_v29 = vpop.f32.mrf.mxu2 }
0x1051   :  { %v563_v30 = vadd.f32 %v841_v24, %v562_v29 }
0x1053   :  { %v646_v31 = vpop.eup %645  ;;  %574 = vst [vmem:[%s923_s6 + $0x30] sm:$0xff] %v563_v30 }
0x1054   :  { %v462_v32 = vmul.f32 0.5, %v646_v31 }
0x1056   :  { %v463_v33 = vadd.f32 0.5, %v462_v32 }
0x1058   :  { %v464_v34 = vsel %vm784_vm3, %v646_v31, %v463_v33 }
0x1059   :  { %467 = vrot.lane.b32.xlu1 %v464_v34, %s731_s0  ;;  %v465_v9 = vmul.f32 %v464_v34, %v425_v19 }
0x10cb   :  { %v468_v35 = vpop.permute.xlu1 %467 }
0x10cc   :  { %v470_v10 = vmul.f32 %v468_v35, %v464_v34 }
0x10ce   :  { %472 = vrot.lane.b32.xlu2 %v470_v10, %s732_s3 }
0x1128   :  { %v473_v36 = vpop.permute.xlu2 %472 }
0x1129   :  { %v475_v37 = vadd.f32 %v473_v36, %v465_v9 }
0x112b   :  { %647 = vtanh.f32 %v475_v37 }
0x1131   :  { %v648_v38 = vpop.eup %647 }
0x1132   :  { %478 = vrot.lane.b32.xlu0 %v648_v38, %s731_s0 }
0x11a4   :  { %v479_v39 = vpop.permute.xlu0 %478 }
0x11a5   :  { %v481_v40 = vmul.f32 %v479_v39, %v464_v34 }
0x11a7   :  { %483 = vrot.lane.b32.xlu1 %v481_v40, %s732_s3 }
0x1219   :  { %v484_v41 = vpop.permute.xlu1 %483 }
0x121a   :  { %486 = vst.msk [vmem:[#allocation2 + $0x38] sm:$0xff] %vm131_vm4, %v484_v41 }
0x1221   :  { %v494_v6 = vld [vmem:[#allocation2 + $0x38] sm:$0xff] }
0x1222   :  { %597 = vmatmul.msk.f32.gmra.mxu2 %vm131_vm4, %v494_v6 }
0x12a5   :  { %v565_v42 = vpop.f32.mrf.mxu2 }
0x12a6   :  { %v566_v43 = vadd.f32 %v841_v24, %v565_v42 }
0x12a8   :  { %575 = vst [vmem:[%s923_s6 + $0x38] sm:$0xff] %v566_v43 }
0x12a9   :  { %580 = vsyncpa [#allocation4], 1 }
0x12aa   :  { %581 = vsyncpa [#allocation6], 1 }

</bundles_post_ra>
